<compile_context>
chip_gen: v5e
topology: v5e:2x2
jax: 0.10.0
libtpu: 0.0.40
codegen_flags: <defaults>
</compile_context>

<pallas_src>
import functools

import jax
import jax.numpy as jnp
from jax import lax
from jax.experimental import pallas as pl
from jax.experimental.pallas import tpu as pltpu


def _round_up(v, m):
    return (v + m - 1) // m * m


def _lstm_kernel(x_ref, w_ih_ref, w_hh_ref, b_ref, fc_w_ref, fc_b_ref,
                 out_ref, pre_ref, *, seq_len, hidden, gate_stride):
    """Single-invocation LSTM + FC head.

    x_ref:    (T*B_pad, D_pad)   matmul dtype, time-major rows (t-major, b-minor)
    w_ih_ref: (D_pad, G)         matmul dtype; gate g's real cols at [g*Hs, g*Hs+H)
    w_hh_ref: (H, G)             matmul dtype, same gate-column layout
    b_ref:    (1, G)             f32, bias_ih + bias_hh, same layout
    fc_w_ref: (H, O_pad)         matmul dtype
    fc_b_ref: (1, O_pad)         f32
    out_ref:  (B_pad, O_pad)     f32 (full (8,128) tile -> lane-dense store)
    pre_ref:  (T*B_pad, G)       f32 VMEM scratch for the hoisted x-projection
    """
    T = seq_len
    H = hidden
    Hs = gate_stride
    Bp = out_ref.shape[0]
    md = x_ref.dtype

    # ---- Hoisted input projection + bias: one well-shaped M = T*B_pad matmul,
    #      completely off the serial h->h recurrence chain. ----
    pre_ref[...] = (jnp.dot(x_ref[...], w_ih_ref[...],
                            preferred_element_type=jnp.float32)
                    + b_ref[...])

    w_hh = w_hh_ref[...]                     # (H, G), resident across the loop

    def step(t_row, h, c):
        g_pre = pre_ref[pl.ds(t_row, Bp), :]                     # (B_pad, G) f32
        gates = g_pre + jnp.dot(h.astype(md), w_hh,
                                preferred_element_type=jnp.float32)
        # One sigmoid over the whole gate slab covers i/f/o (PyTorch gate order
        # [i, f, g, o]); the g gate gets its own tanh on just its H lanes.
        sig = jax.nn.sigmoid(gates)
        i_g = sig[:, 0 * Hs:0 * Hs + H]
        f_g = sig[:, 1 * Hs:1 * Hs + H]
        o_g = sig[:, 3 * Hs:3 * Hs + H]
        g_g = jnp.tanh(gates[:, 2 * Hs:2 * Hs + H])
        c_new = f_g * c + i_g * g_g
        h_new = o_g * jnp.tanh(c_new)
        return h_new, c_new

    h = jnp.zeros((Bp, H), jnp.float32)      # exact-width f32 recurrence state
    c = jnp.zeros((Bp, H), jnp.float32)

    if T <= 32:
        # Static unroll: full LLO scheduling visibility for short sequences.
        for t in range(T):
            h, c = step(t * Bp, h, c)
    else:
        # Partial unroll bounds code size / vreg live ranges for long sequences.
        def body(t, carry):
            h_, c_ = carry
            t_row = pl.multiple_of(t * Bp, Bp)
            return step(t_row, h_, c_)
        h, c = lax.fori_loop(0, T, body, (h, c), unroll=8)

    # FC head on the last hidden state (runs once, after the loop).
    out_ref[...] = (jnp.dot(h.astype(md), fc_w_ref[...],
                            preferred_element_type=jnp.float32)
                    + fc_b_ref[...])


def pack_simple_lstm_params(weight_ih, weight_hh, bias_ih, bias_hh,
                            fc_weight, fc_bias, *, matmul_dtype=jnp.float32):
    """One-time weight preprocessing (hoisted out of the per-call forward).

    Takes PyTorch-layout parameters:
      weight_ih_l0 (4H, D), weight_hh_l0 (4H, H), bias_ih_l0 (4H,),
      bias_hh_l0 (4H,), fc.weight (O, H), fc.bias (O,); gate order [i, f, g, o].

    matmul_dtype=float32 matches the PyTorch module's numerics; pass
    jnp.bfloat16 explicitly to trade small output differences for MXU
    throughput (accumulation and gate/state math stay f32 in-kernel).
    """
    fourH, D = weight_ih.shape
    H = weight_hh.shape[1]
    O = fc_weight.shape[0]
    assert fourH == 4 * H and weight_hh.shape[0] == 4 * H

    D_pad = _round_up(D, 128)
    O_pad = _round_up(O, 128)
    # Gate lane layout: if all four gates fit one 128-lane slab, pack them
    # contiguously (stride H) -> recurrent matmul N = 128 and 1 sigmoid slab.
    # Otherwise each gate gets its own lane-aligned slab (stride H_pad).
    if 4 * H <= 128:
        Hs, G = H, 128
    else:
        Hs = _round_up(H, 128)
        G = 4 * Hs

    w_ih_t = jnp.transpose(weight_ih).astype(jnp.float32)   # (D, 4H)
    w_hh_t = jnp.transpose(weight_hh).astype(jnp.float32)   # (H, 4H)
    b = (bias_ih + bias_hh).astype(jnp.float32).reshape(-1)  # (4H,)

    w_ih_p = jnp.zeros((D_pad, G), jnp.float32)
    w_hh_p = jnp.zeros((H, G), jnp.float32)
    b_p = jnp.zeros((1, G), jnp.float32)
    for g in range(4):
        src = slice(g * H, (g + 1) * H)
        dst = slice(g * Hs, g * Hs + H)
        w_ih_p = w_ih_p.at[:D, dst].set(w_ih_t[:, src])
        w_hh_p = w_hh_p.at[:, dst].set(w_hh_t[:, src])
        b_p = b_p.at[0, dst].set(b[src])

    fc_w_p = jnp.zeros((H, O_pad), jnp.float32).at[:, :O].set(
        jnp.transpose(fc_weight).astype(jnp.float32))
    fc_b_p = jnp.zeros((1, O_pad), jnp.float32).at[0, :O].set(
        fc_bias.astype(jnp.float32))

    return {
        "w_ih": w_ih_p.astype(matmul_dtype),
        "w_hh": w_hh_p.astype(matmul_dtype),
        "b": b_p,
        "fc_w": fc_w_p.astype(matmul_dtype),
        "fc_b": fc_b_p,
    }


@functools.partial(jax.jit, static_argnames=("out_features",))
def simple_lstm_forward(x, params, *, out_features):
    """x: (B, T, input_size) batch-first, like the PyTorch module.
    Returns (B, out_features) float32."""
    w_ih, w_hh = params["w_ih"], params["w_hh"]
    b, fc_w, fc_b = params["b"], params["fc_w"], params["fc_b"]

    B, T, D = x.shape
    D_pad, G = w_ih.shape
    H = w_hh.shape[0]
    O_pad = fc_w.shape[1]
    Hs = H if 4 * H <= 128 else G // 4
    md = w_ih.dtype

    B_pad = _round_up(max(B, 1), 8)          # f32 sublane multiple

    # Time-major, padded, flattened activations: (T*B_pad, D_pad).  The padding
    # pass subsumes the batch-first -> time-major transpose; padded batch rows
    # and padded input lanes are zero (and only ever sliced off at the end).
    x_tm = jnp.zeros((T, B_pad, D_pad), md)
    x_tm = x_tm.at[:, :B, :D].set(jnp.transpose(x, (1, 0, 2)).astype(md))
    x_flat = x_tm.reshape(T * B_pad, D_pad)

    # Explicit VMEM budget (v7x: 64 MiB physical, 32 MiB default scoped limit).
    itemsize = jnp.dtype(md).itemsize
    need = (x_flat.size * itemsize
            + (w_ih.size + w_hh.size + fc_w.size) * itemsize
            + (b.size + fc_b.size) * 4
            + T * B_pad * G * 4               # pre-gate scratch
            + B_pad * O_pad * 4)
    vmem_limit = min(int(need) + (16 << 20), 48 << 20)

    kernel = functools.partial(_lstm_kernel, seq_len=T, hidden=H,
                               gate_stride=Hs)
    out = pl.pallas_call(
        kernel,
        out_shape=jax.ShapeDtypeStruct((B_pad, O_pad), jnp.float32),
        # Gridless: everything is VMEM-resident for one invocation at these
        # shapes (see TODOs above for the large-T / large-B variants).
        in_specs=[pl.BlockSpec(memory_space=pltpu.MemorySpace.VMEM)] * 6,
        out_specs=pl.BlockSpec(memory_space=pltpu.MemorySpace.VMEM),
        scratch_shapes=[pltpu.VMEM((T * B_pad, G), jnp.float32)],
        compiler_params=pltpu.CompilerParams(vmem_limit_bytes=vmem_limit),
    )(x_flat, w_ih, w_hh, b, fc_w, fc_b)

    return out[:B, :out_features]


def _reference_forward(x, weight_ih, weight_hh, bias_ih, bias_hh,
                       fc_weight, fc_bias):
    """Pure-JAX reference with exactly the nn.LSTM + nn.Linear math."""
    B, T, _ = x.shape
    H = weight_hh.shape[1]
    w_ih_t = weight_ih.T                     # (D, 4H)
    w_hh_t = weight_hh.T                     # (H, 4H)
    bias = bias_ih + bias_hh

    def step(carry, x_t):
        h, c = carry
        gates = x_t @ w_ih_t + h @ w_hh_t + bias
        i = jax.nn.sigmoid(gates[:, 0 * H:1 * H])
        f = jax.nn.sigmoid(gates[:, 1 * H:2 * H])
        g = jnp.tanh(gates[:, 2 * H:3 * H])
        o = jax.nn.sigmoid(gates[:, 3 * H:4 * H])
        c = f * c + i * g
        h = o * jnp.tanh(c)
        return (h, c), None

    init = (jnp.zeros((B, H), jnp.float32), jnp.zeros((B, H), jnp.float32))
    (h_last, _), _ = lax.scan(step, init, jnp.transpose(x, (1, 0, 2)))
    return h_last @ fc_weight.T + fc_bias


if __name__ == "__main__":
    # Small shapes consistent with the module's forward.
    B, T, D, H, O = 2, 8, 16, 32, 8

    key = jax.random.PRNGKey(0)
    ks = jax.random.split(key, 7)
    scale = 1.0 / jnp.sqrt(jnp.float32(H))   # PyTorch LSTM/Linear default range

    x = jax.random.normal(ks[0], (B, T, D), jnp.float32)
    # Parameters in PyTorch layout (weight_ih_l0, weight_hh_l0, biases, fc).
    weight_ih = jax.random.uniform(ks[1], (4 * H, D), jnp.float32, -scale, scale)
    weight_hh = jax.random.uniform(ks[2], (4 * H, H), jnp.float32, -scale, scale)
    bias_ih = jax.random.uniform(ks[3], (4 * H,), jnp.float32, -scale, scale)
    bias_hh = jax.random.uniform(ks[4], (4 * H,), jnp.float32, -scale, scale)
    fc_weight = jax.random.uniform(ks[5], (O, H), jnp.float32, -scale, scale)
    fc_bias = jax.random.uniform(ks[6], (O,), jnp.float32, -scale, scale)

    # One-time weight packing (f32 default = PyTorch-parity numerics).
    params = pack_simple_lstm_params(weight_ih, weight_hh, bias_ih, bias_hh,
                                     fc_weight, fc_bias,
                                     matmul_dtype=jnp.float32)

    out = simple_lstm_forward(x, params, out_features=O)
    out = jax.block_until_ready(out)
    assert out.shape == (B, O)

    ref = _reference_forward(x, weight_ih, weight_hh, bias_ih, bias_hh,
                             fc_weight, fc_bias)
    assert jnp.allclose(out, ref, atol=1e-4, rtol=1e-4), \
        "mismatch vs f32 JAX reference (module semantics)"

    print("KERNEL_OK")
</pallas_src>

<mosaic_0001>
module attributes {stable_mosaic.version = 11 : i64} {
  func.func @_lstm_kernel(%arg0: memref<64x128xf32, #tpu.memory_space<vmem>>, %arg1: memref<128x128xf32, #tpu.memory_space<vmem>>, %arg2: memref<32x128xf32, #tpu.memory_space<vmem>>, %arg3: memref<1x128xf32, #tpu.memory_space<vmem>>, %arg4: memref<32x128xf32, #tpu.memory_space<vmem>>, %arg5: memref<1x128xf32, #tpu.memory_space<vmem>>, %arg6: memref<8x128xf32, #tpu.memory_space<vmem>>, %arg7: memref<64x128xf32, #tpu.memory_space<vmem>>) attributes {dimension_semantics = [], scalar_prefetch = 0 : i64, scratch_operands = 1 : i64, tpu.core_type = #tpu.core_type<tc>} {
    %c0 = arith.constant 0 : index
    %c0_0 = arith.constant 0 : index
    %0 = vector.load %arg0[%c0, %c0_0] : memref<64x128xf32, #tpu.memory_space<vmem>>, vector<64x128xf32>
    %c0_1 = arith.constant 0 : index
    %c0_2 = arith.constant 0 : index
    %1 = vector.load %arg1[%c0_1, %c0_2] : memref<128x128xf32, #tpu.memory_space<vmem>>, vector<128x128xf32>
    %cst = arith.constant dense<0.000000e+00> : vector<64x128xf32>
    %2 = tpu.matmul %0, %1, %cst {dimension_numbers = #tpu.dot_dimension_numbers<[1], [0], [0], [1], [0, 0, 1, 1], [], []>} : vector<64x128xf32>, vector<128x128xf32>, vector<64x128xf32> -> vector<64x128xf32>
    %c0_3 = arith.constant 0 : index
    %c0_4 = arith.constant 0 : index
    %3 = vector.load %arg3[%c0_3, %c0_4] : memref<1x128xf32, #tpu.memory_space<vmem>>, vector<1x128xf32>
    %4 = vector.broadcast %3 : vector<1x128xf32> to vector<64x128xf32>
    %5 = arith.addf %2, %4 : vector<64x128xf32>
    %c0_5 = arith.constant 0 : index
    %c0_6 = arith.constant 0 : index
    %6 = vector.load %arg7[%c0_5, %c0_6] : memref<64x128xf32, #tpu.memory_space<vmem>>, vector<64x128xf32>
    tpu.vector_store %arg7[%c0_5, %c0_6], %5 {strides = array<i32>} : memref<64x128xf32, #tpu.memory_space<vmem>>, vector<64x128xf32>,
    %c0_7 = arith.constant 0 : index
    %c0_8 = arith.constant 0 : index
    %7 = vector.load %arg2[%c0_7, %c0_8] : memref<32x128xf32, #tpu.memory_space<vmem>>, vector<32x128xf32>
    %cst_9 = arith.constant 0.000000e+00 : f32
    %8 = vector.broadcast %cst_9 : f32 to vector<8x32xf32>
    %cst_10 = arith.constant 0.000000e+00 : f32
    %9 = vector.broadcast %cst_10 : f32 to vector<8x32xf32>
    %c0_11 = arith.constant 0 : index
    %c0_12 = arith.constant 0 : index
    %10 = vector.load %arg7[%c0_11, %c0_12] : memref<64x128xf32, #tpu.memory_space<vmem>>, vector<8x128xf32>
    %cst_13 = arith.constant dense<0.000000e+00> : vector<8x128xf32>
    %11 = tpu.matmul %8, %7, %cst_13 {dimension_numbers = #tpu.dot_dimension_numbers<[1], [0], [0], [1], [0, 0, 1, 1], [], []>} : vector<8x32xf32>, vector<32x128xf32>, vector<8x128xf32> -> vector<8x128xf32>
    %12 = arith.addf %10, %11 : vector<8x128xf32>
    %13 = arith.negf %12 : vector<8x128xf32>
    %14 = math.exp %13 : vector<8x128xf32>
    %cst_14 = arith.constant 1.000000e+00 : f32
    %15 = vector.broadcast %cst_14 : f32 to vector<8x128xf32>
    %16 = arith.addf %15, %14 : vector<8x128xf32>
    %17 = arith.divf %15, %16 : vector<8x128xf32>
    %18 = vector.extract_strided_slice %17 {offsets = [0, 0], sizes = [8, 32], strides = [1, 1]} : vector<8x128xf32> to vector<8x32xf32>
    %19 = vector.extract_strided_slice %17 {offsets = [0, 32], sizes = [8, 32], strides = [1, 1]} : vector<8x128xf32> to vector<8x32xf32>
    %20 = vector.extract_strided_slice %17 {offsets = [0, 96], sizes = [8, 32], strides = [1, 1]} : vector<8x128xf32> to vector<8x32xf32>
    %21 = vector.extract_strided_slice %12 {offsets = [0, 64], sizes = [8, 32], strides = [1, 1]} : vector<8x128xf32> to vector<8x32xf32>
    %22 = math.tanh %21 : vector<8x32xf32>
    %23 = arith.mulf %19, %9 : vector<8x32xf32>
    %24 = arith.mulf %18, %22 : vector<8x32xf32>
    %25 = arith.addf %23, %24 : vector<8x32xf32>
    %26 = math.tanh %25 : vector<8x32xf32>
    %27 = arith.mulf %20, %26 : vector<8x32xf32>
    %c8 = arith.constant 8 : index
    %c0_15 = arith.constant 0 : index
    %28 = vector.load %arg7[%c8, %c0_15] : memref<64x128xf32, #tpu.memory_space<vmem>>, vector<8x128xf32>
    %cst_16 = arith.constant dense<0.000000e+00> : vector<8x128xf32>
    %29 = tpu.matmul %27, %7, %cst_16 {dimension_numbers = #tpu.dot_dimension_numbers<[1], [0], [0], [1], [0, 0, 1, 1], [], []>} : vector<8x32xf32>, vector<32x128xf32>, vector<8x128xf32> -> vector<8x128xf32>
    %30 = arith.addf %28, %29 : vector<8x128xf32>
    %31 = arith.negf %30 : vector<8x128xf32>
    %32 = math.exp %31 : vector<8x128xf32>
    %cst_17 = arith.constant 1.000000e+00 : f32
    %33 = vector.broadcast %cst_17 : f32 to vector<8x128xf32>
    %34 = arith.addf %33, %32 : vector<8x128xf32>
    %35 = arith.divf %33, %34 : vector<8x128xf32>
    %36 = vector.extract_strided_slice %35 {offsets = [0, 0], sizes = [8, 32], strides = [1, 1]} : vector<8x128xf32> to vector<8x32xf32>
    %37 = vector.extract_strided_slice %35 {offsets = [0, 32], sizes = [8, 32], strides = [1, 1]} : vector<8x128xf32> to vector<8x32xf32>
    %38 = vector.extract_strided_slice %35 {offsets = [0, 96], sizes = [8, 32], strides = [1, 1]} : vector<8x128xf32> to vector<8x32xf32>
    %39 = vector.extract_strided_slice %30 {offsets = [0, 64], sizes = [8, 32], strides = [1, 1]} : vector<8x128xf32> to vector<8x32xf32>
    %40 = math.tanh %39 : vector<8x32xf32>
    %41 = arith.mulf %37, %25 : vector<8x32xf32>
    %42 = arith.mulf %36, %40 : vector<8x32xf32>
    %43 = arith.addf %41, %42 : vector<8x32xf32>
    %44 = math.tanh %43 : vector<8x32xf32>
    %45 = arith.mulf %38, %44 : vector<8x32xf32>
    %c16 = arith.constant 16 : index
    %c0_18 = arith.constant 0 : index
    %46 = vector.load %arg7[%c16, %c0_18] : memref<64x128xf32, #tpu.memory_space<vmem>>, vector<8x128xf32>
    %cst_19 = arith.constant dense<0.000000e+00> : vector<8x128xf32>
    %47 = tpu.matmul %45, %7, %cst_19 {dimension_numbers = #tpu.dot_dimension_numbers<[1], [0], [0], [1], [0, 0, 1, 1], [], []>} : vector<8x32xf32>, vector<32x128xf32>, vector<8x128xf32> -> vector<8x128xf32>
    %48 = arith.addf %46, %47 : vector<8x128xf32>
    %49 = arith.negf %48 : vector<8x128xf32>
    %50 = math.exp %49 : vector<8x128xf32>
    %cst_20 = arith.constant 1.000000e+00 : f32
    %51 = vector.broadcast %cst_20 : f32 to vector<8x128xf32>
    %52 = arith.addf %51, %50 : vector<8x128xf32>
    %53 = arith.divf %51, %52 : vector<8x128xf32>
    %54 = vector.extract_strided_slice %53 {offsets = [0, 0], sizes = [8, 32], strides = [1, 1]} : vector<8x128xf32> to vector<8x32xf32>
    %55 = vector.extract_strided_slice %53 {offsets = [0, 32], sizes = [8, 32], strides = [1, 1]} : vector<8x128xf32> to vector<8x32xf32>
    %56 = vector.extract_strided_slice %53 {offsets = [0, 96], sizes = [8, 32], strides = [1, 1]} : vector<8x128xf32> to vector<8x32xf32>
    %57 = vector.extract_strided_slice %48 {offsets = [0, 64], sizes = [8, 32], strides = [1, 1]} : vector<8x128xf32> to vector<8x32xf32>
    %58 = math.tanh %57 : vector<8x32xf32>
    %59 = arith.mulf %55, %43 : vector<8x32xf32>
    %60 = arith.mulf %54, %58 : vector<8x32xf32>
    %61 = arith.addf %59, %60 : vector<8x32xf32>
    %62 = math.tanh %61 : vector<8x32xf32>
    %63 = arith.mulf %56, %62 : vector<8x32xf32>
    %c24 = arith.constant 24 : index
    %c0_21 = arith.constant 0 : index
    %64 = vector.load %arg7[%c24, %c0_21] : memref<64x128xf32, #tpu.memory_space<vmem>>, vector<8x128xf32>
    %cst_22 = arith.constant dense<0.000000e+00> : vector<8x128xf32>
    %65 = tpu.matmul %63, %7, %cst_22 {dimension_numbers = #tpu.dot_dimension_numbers<[1], [0], [0], [1], [0, 0, 1, 1], [], []>} : vector<8x32xf32>, vector<32x128xf32>, vector<8x128xf32> -> vector<8x128xf32>
    %66 = arith.addf %64, %65 : vector<8x128xf32>
    %67 = arith.negf %66 : vector<8x128xf32>
    %68 = math.exp %67 : vector<8x128xf32>
    %cst_23 = arith.constant 1.000000e+00 : f32
    %69 = vector.broadcast %cst_23 : f32 to vector<8x128xf32>
    %70 = arith.addf %69, %68 : vector<8x128xf32>
    %71 = arith.divf %69, %70 : vector<8x128xf32>
    %72 = vector.extract_strided_slice %71 {offsets = [0, 0], sizes = [8, 32], strides = [1, 1]} : vector<8x128xf32> to vector<8x32xf32>
    %73 = vector.extract_strided_slice %71 {offsets = [0, 32], sizes = [8, 32], strides = [1, 1]} : vector<8x128xf32> to vector<8x32xf32>
    %74 = vector.extract_strided_slice %71 {offsets = [0, 96], sizes = [8, 32], strides = [1, 1]} : vector<8x128xf32> to vector<8x32xf32>
    %75 = vector.extract_strided_slice %66 {offsets = [0, 64], sizes = [8, 32], strides = [1, 1]} : vector<8x128xf32> to vector<8x32xf32>
    %76 = math.tanh %75 : vector<8x32xf32>
    %77 = arith.mulf %73, %61 : vector<8x32xf32>
    %78 = arith.mulf %72, %76 : vector<8x32xf32>
    %79 = arith.addf %77, %78 : vector<8x32xf32>
    %80 = math.tanh %79 : vector<8x32xf32>
    %81 = arith.mulf %74, %80 : vector<8x32xf32>
    %c32 = arith.constant 32 : index
    %c0_24 = arith.constant 0 : index
    %82 = vector.load %arg7[%c32, %c0_24] : memref<64x128xf32, #tpu.memory_space<vmem>>, vector<8x128xf32>
    %cst_25 = arith.constant dense<0.000000e+00> : vector<8x128xf32>
    %83 = tpu.matmul %81, %7, %cst_25 {dimension_numbers = #tpu.dot_dimension_numbers<[1], [0], [0], [1], [0, 0, 1, 1], [], []>} : vector<8x32xf32>, vector<32x128xf32>, vector<8x128xf32> -> vector<8x128xf32>
    %84 = arith.addf %82, %83 : vector<8x128xf32>
    %85 = arith.negf %84 : vector<8x128xf32>
    %86 = math.exp %85 : vector<8x128xf32>
    %cst_26 = arith.constant 1.000000e+00 : f32
    %87 = vector.broadcast %cst_26 : f32 to vector<8x128xf32>
    %88 = arith.addf %87, %86 : vector<8x128xf32>
    %89 = arith.divf %87, %88 : vector<8x128xf32>
    %90 = vector.extract_strided_slice %89 {offsets = [0, 0], sizes = [8, 32], strides = [1, 1]} : vector<8x128xf32> to vector<8x32xf32>
    %91 = vector.extract_strided_slice %89 {offsets = [0, 32], sizes = [8, 32], strides = [1, 1]} : vector<8x128xf32> to vector<8x32xf32>
    %92 = vector.extract_strided_slice %89 {offsets = [0, 96], sizes = [8, 32], strides = [1, 1]} : vector<8x128xf32> to vector<8x32xf32>
    %93 = vector.extract_strided_slice %84 {offsets = [0, 64], sizes = [8, 32], strides = [1, 1]} : vector<8x128xf32> to vector<8x32xf32>
    %94 = math.tanh %93 : vector<8x32xf32>
    %95 = arith.mulf %91, %79 : vector<8x32xf32>
    %96 = arith.mulf %90, %94 : vector<8x32xf32>
    %97 = arith.addf %95, %96 : vector<8x32xf32>
    %98 = math.tanh %97 : vector<8x32xf32>
    %99 = arith.mulf %92, %98 : vector<8x32xf32>
    %c40 = arith.constant 40 : index
    %c0_27 = arith.constant 0 : index
    %100 = vector.load %arg7[%c40, %c0_27] : memref<64x128xf32, #tpu.memory_space<vmem>>, vector<8x128xf32>
    %cst_28 = arith.constant dense<0.000000e+00> : vector<8x128xf32>
    %101 = tpu.matmul %99, %7, %cst_28 {dimension_numbers = #tpu.dot_dimension_numbers<[1], [0], [0], [1], [0, 0, 1, 1], [], []>} : vector<8x32xf32>, vector<32x128xf32>, vector<8x128xf32> -> vector<8x128xf32>
    %102 = arith.addf %100, %101 : vector<8x128xf32>
    %103 = arith.negf %102 : vector<8x128xf32>
    %104 = math.exp %103 : vector<8x128xf32>
    %cst_29 = arith.constant 1.000000e+00 : f32
    %105 = vector.broadcast %cst_29 : f32 to vector<8x128xf32>
    %106 = arith.addf %105, %104 : vector<8x128xf32>
    %107 = arith.divf %105, %106 : vector<8x128xf32>
    %108 = vector.extract_strided_slice %107 {offsets = [0, 0], sizes = [8, 32], strides = [1, 1]} : vector<8x128xf32> to vector<8x32xf32>
    %109 = vector.extract_strided_slice %107 {offsets = [0, 32], sizes = [8, 32], strides = [1, 1]} : vector<8x128xf32> to vector<8x32xf32>
    %110 = vector.extract_strided_slice %107 {offsets = [0, 96], sizes = [8, 32], strides = [1, 1]} : vector<8x128xf32> to vector<8x32xf32>
    %111 = vector.extract_strided_slice %102 {offsets = [0, 64], sizes = [8, 32], strides = [1, 1]} : vector<8x128xf32> to vector<8x32xf32>
    %112 = math.tanh %111 : vector<8x32xf32>
    %113 = arith.mulf %109, %97 : vector<8x32xf32>
    %114 = arith.mulf %108, %112 : vector<8x32xf32>
    %115 = arith.addf %113, %114 : vector<8x32xf32>
    %116 = math.tanh %115 : vector<8x32xf32>
    %117 = arith.mulf %110, %116 : vector<8x32xf32>
    %c48 = arith.constant 48 : index
    %c0_30 = arith.constant 0 : index
    %118 = vector.load %arg7[%c48, %c0_30] : memref<64x128xf32, #tpu.memory_space<vmem>>, vector<8x128xf32>
    %cst_31 = arith.constant dense<0.000000e+00> : vector<8x128xf32>
    %119 = tpu.matmul %117, %7, %cst_31 {dimension_numbers = #tpu.dot_dimension_numbers<[1], [0], [0], [1], [0, 0, 1, 1], [], []>} : vector<8x32xf32>, vector<32x128xf32>, vector<8x128xf32> -> vector<8x128xf32>
    %120 = arith.addf %118, %119 : vector<8x128xf32>
    %121 = arith.negf %120 : vector<8x128xf32>
    %122 = math.exp %121 : vector<8x128xf32>
    %cst_32 = arith.constant 1.000000e+00 : f32
    %123 = vector.broadcast %cst_32 : f32 to vector<8x128xf32>
    %124 = arith.addf %123, %122 : vector<8x128xf32>
    %125 = arith.divf %123, %124 : vector<8x128xf32>
    %126 = vector.extract_strided_slice %125 {offsets = [0, 0], sizes = [8, 32], strides = [1, 1]} : vector<8x128xf32> to vector<8x32xf32>
    %127 = vector.extract_strided_slice %125 {offsets = [0, 32], sizes = [8, 32], strides = [1, 1]} : vector<8x128xf32> to vector<8x32xf32>
    %128 = vector.extract_strided_slice %125 {offsets = [0, 96], sizes = [8, 32], strides = [1, 1]} : vector<8x128xf32> to vector<8x32xf32>
    %129 = vector.extract_strided_slice %120 {offsets = [0, 64], sizes = [8, 32], strides = [1, 1]} : vector<8x128xf32> to vector<8x32xf32>
    %130 = math.tanh %129 : vector<8x32xf32>
    %131 = arith.mulf %127, %115 : vector<8x32xf32>
    %132 = arith.mulf %126, %130 : vector<8x32xf32>
    %133 = arith.addf %131, %132 : vector<8x32xf32>
    %134 = math.tanh %133 : vector<8x32xf32>
    %135 = arith.mulf %128, %134 : vector<8x32xf32>
    %c56 = arith.constant 56 : index
    %c0_33 = arith.constant 0 : index
    %136 = vector.load %arg7[%c56, %c0_33] : memref<64x128xf32, #tpu.memory_space<vmem>>, vector<8x128xf32>
    %cst_34 = arith.constant dense<0.000000e+00> : vector<8x128xf32>
    %137 = tpu.matmul %135, %7, %cst_34 {dimension_numbers = #tpu.dot_dimension_numbers<[1], [0], [0], [1], [0, 0, 1, 1], [], []>} : vector<8x32xf32>, vector<32x128xf32>, vector<8x128xf32> -> vector<8x128xf32>
    %138 = arith.addf %136, %137 : vector<8x128xf32>
    %139 = arith.negf %138 : vector<8x128xf32>
    %140 = math.exp %139 : vector<8x128xf32>
    %cst_35 = arith.constant 1.000000e+00 : f32
    %141 = vector.broadcast %cst_35 : f32 to vector<8x128xf32>
    %142 = arith.addf %141, %140 : vector<8x128xf32>
    %143 = arith.divf %141, %142 : vector<8x128xf32>
    %144 = vector.extract_strided_slice %143 {offsets = [0, 0], sizes = [8, 32], strides = [1, 1]} : vector<8x128xf32> to vector<8x32xf32>
    %145 = vector.extract_strided_slice %143 {offsets = [0, 32], sizes = [8, 32], strides = [1, 1]} : vector<8x128xf32> to vector<8x32xf32>
    %146 = vector.extract_strided_slice %143 {offsets = [0, 96], sizes = [8, 32], strides = [1, 1]} : vector<8x128xf32> to vector<8x32xf32>
    %147 = vector.extract_strided_slice %138 {offsets = [0, 64], sizes = [8, 32], strides = [1, 1]} : vector<8x128xf32> to vector<8x32xf32>
    %148 = math.tanh %147 : vector<8x32xf32>
    %149 = arith.mulf %145, %133 : vector<8x32xf32>
    %150 = arith.mulf %144, %148 : vector<8x32xf32>
    %151 = arith.addf %149, %150 : vector<8x32xf32>
    %152 = math.tanh %151 : vector<8x32xf32>
    %153 = arith.mulf %146, %152 : vector<8x32xf32>
    %c0_36 = arith.constant 0 : index
    %c0_37 = arith.constant 0 : index
    %154 = vector.load %arg4[%c0_36, %c0_37] : memref<32x128xf32, #tpu.memory_space<vmem>>, vector<32x128xf32>
    %cst_38 = arith.constant dense<0.000000e+00> : vector<8x128xf32>
    %155 = tpu.matmul %153, %154, %cst_38 {dimension_numbers = #tpu.dot_dimension_numbers<[1], [0], [0], [1], [0, 0, 1, 1], [], []>} : vector<8x32xf32>, vector<32x128xf32>, vector<8x128xf32> -> vector<8x128xf32>
    %c0_39 = arith.constant 0 : index
    %c0_40 = arith.constant 0 : index
    %156 = vector.load %arg5[%c0_39, %c0_40] : memref<1x128xf32, #tpu.memory_space<vmem>>, vector<1x128xf32>
    %157 = vector.broadcast %156 : vector<1x128xf32> to vector<8x128xf32>
    %158 = arith.addf %155, %157 : vector<8x128xf32>
    %c0_41 = arith.constant 0 : index
    %c0_42 = arith.constant 0 : index
    %159 = vector.load %arg6[%c0_41, %c0_42] : memref<8x128xf32, #tpu.memory_space<vmem>>, vector<8x128xf32>
    tpu.vector_store %arg6[%c0_41, %c0_42], %158 {strides = array<i32>} : memref<8x128xf32, #tpu.memory_space<vmem>>, vector<8x128xf32>,
    return
  }
}

</mosaic_0001>

<bundles_post_ra>
// kernel: simple_lstm_forward.1
= control target key start
LH: loop header
LB: loop body
LE: loop exit
PB: predicated region body
PF: predicated region fallthrough
CT: control target
= control target key end

     0   :  { %11 = vsyncpa [#allocation4], 0  ;;  %s784_s24 = smov [#allocation3]   ;;  %s785_s26 = smov 128   ;;  %s975_s0 = inlined_call_operand.vmem [shape: f32[64,128], index: 0, kind: input, shape index: {}]   ;;  %s976_s1 = inlined_call_operand.hbm [shape: f32[128,128], index: 1, kind: input, shape index: {}]   ;;  %s977_s2 = inlined_call_operand.vmem [shape: f32[32,128], index: 2, kind: input, shape index: {}]   ;;  %s978_s3 = inlined_call_operand.vmem [shape: f32[1,128], index: 3, kind: input, shape index: {}]   ;;  %s979_s4 = inlined_call_operand.vmem [shape: f32[32,128], index: 4, kind: input, shape index: {}]   ;;  %s980_s5 = inlined_call_operand.vmem [shape: f32[1,128], index: 5, kind: input, shape index: {}]   ;;  %s981_s6 = inlined_call_operand.vmem [shape: f32[8,128], index: 6, kind: output, shape index: {}]  }
   0x1   :  { %s18_s23 = sshll.u32 %s976_s1, 4  ;;  %s20_s25 = sshll.u32 %s784_s24, 4  ;;  %s19_s23 = int_to_ptr.hbm [resolvable:$true] %s18_s23  ;;  %s21_s25 = int_to_ptr.vmem [resolvable:$true] %s20_s25 }
   0x2   :  { %s786_s27 = smov 8  }
   0x3   :  { %26 = dma.hbm_to_vmem [thread:$0]  %s19_s23, 2048, %s21_s25, [#allocation4], %s785_s26, %s785_s26, %s786_s27  }
   0x4   :  { %782 = dma.done.wait [#allocation4], 2048  }
   0x5   :  { %783 = vsyncadd [#allocation4], 4294965248  ;;  %v62_v0 = vld [vmem:[#allocation3 + $0x78] sm:$0xff]  ;;  %v61_v1 = vld [vmem:[#allocation3 + $0x70] sm:$0xff]  ;;  %v787_v12 = vmov 0.0   ;;  %s788_s14 = smov 64  }
   0x6   :  { %67 = vmatpush.msra.mxu0 %v62_v0  ;;  %v60_v2 = vld [vmem:[#allocation3 + $0x68] sm:$0xff]  ;;  %v59_v3 = vld [vmem:[#allocation3 + $0x60] sm:$0xff]  ;;  %v831_v4 = vld [vmem:[%s977_s2 + $0x18] sm:$0xff]  ;;  %vm121_vm4 = vcmask 261120  }
   0x7   :  { %137 = vmatpush.msra.mxu1 %v831_v4  ;;  %v837_v5 = vld [vmem:[%s977_s2 + $0x10] sm:$0xff]  ;;  %v58_v6 = vld [vmem:[#allocation3 + $0x58] sm:$0xff]  ;;  %v842_v7 = vld [vmem:[%s977_s2 + $0x8] sm:$0xff]  ;;  %201 = vmatpush.msra.mxu2 %v831_v4 }
   0x8   :  { %68 = vmatpush.msra.mxu0 %v61_v1  ;;  %265 = vmatpush.msra.mxu3 %v831_v4  ;;  %v57_v8 = vld [vmem:[#allocation3 + $0x50] sm:$0xff]  ;;  %v850_v9 = vld [vmem:[%s977_s2] sm:$0xff]  ;;  %v56_v10 = vld [vmem:[#allocation3 + $0x48] sm:$0xff] }
   0x9   :  { %138 = vmatpush.msra.mxu1 %v837_v5  ;;  %202 = vmatpush.msra.mxu2 %v837_v5  ;;  %v55_v11 = vld [vmem:[#allocation3 + $0x40] sm:$0xff]  ;;  %v54_v13 = vld [vmem:[#allocation3 + $0x38] sm:$0xff]  ;;  %v53_v14 = vld [vmem:[#allocation3 + $0x30] sm:$0xff] }
   0xa   :  { %69 = vmatpush.msra.mxu0 %v60_v2  ;;  %266 = vmatpush.msra.mxu3 %v837_v5  ;;  %v52_v15 = vld [vmem:[#allocation3 + $0x28] sm:$0xff]  ;;  %v51_v16 = vld [vmem:[#allocation3 + $0x20] sm:$0xff]  ;;  %v50_v17 = vld [vmem:[#allocation3 + $0x18] sm:$0xff] }
   0xb   :  { %139 = vmatpush.msra.mxu1 %v842_v7  ;;  %203 = vmatpush.msra.mxu2 %v842_v7  ;;  %v49_v18 = vld [vmem:[#allocation3 + $0x10] sm:$0xff]  ;;  %v48_v19 = vld [vmem:[#allocation3 + $0x8] sm:$0xff]  ;;  %v47_v20 = vld [vmem:[#allocation3] sm:$0xff] }
   0xc   :  { %70 = vmatpush.msra.mxu0 %v59_v3  ;;  %267 = vmatpush.msra.mxu3 %v842_v7  ;;  %v39_v21 = vld [vmem:[%s975_s0] sm:$0xff]  ;;  %v40_v49 = vld [vmem:[%s975_s0 + $0x8] sm:$0xff] }
   0xd   :  { %140 = vmatpush.msra.mxu1 %v850_v9  ;;  %204 = vmatpush.msra.mxu2 %v850_v9  ;;  %v882_v22 = vld [vmem:[%s978_s3] ss:$0 sm:$0xff]  ;;  %s789_s3 = smov 32  }
   0xe   :  { %71 = vmatpush.msra.mxu0 %v58_v6  ;;  %141 = vmatmul.f32.vlgmr.msra.gmra.mxu1 %v787_v12 }
   0xf   :  { %268 = vmatpush.msra.mxu3 %v850_v9  ;;  %329 = vmatpush.msrb.mxu1 %v831_v4 }
  0x10   :  { %72 = vmatpush.msra.mxu0 %v57_v8  ;;  %393 = vmatpush.msrb.mxu2 %v831_v4 }
  0x11   :  { %457 = vmatpush.msrb.mxu3 %v831_v4  ;;  %330 = vmatpush.msrb.mxu1 %v837_v5 }
  0x12   :  { %73 = vmatpush.msra.mxu0 %v56_v10  ;;  %394 = vmatpush.msrb.mxu2 %v837_v5 }
  0x13   :  { %458 = vmatpush.msrb.mxu3 %v837_v5  ;;  %331 = vmatpush.msrb.mxu1 %v842_v7 }
  0x14   :  { %74 = vmatpush.msra.mxu0 %v55_v11  ;;  %395 = vmatpush.msrb.mxu2 %v842_v7 }
  0x15   :  { %459 = vmatpush.msrb.mxu3 %v842_v7  ;;  %332 = vmatpush.msrb.mxu1 %v850_v9 }
  0x16   :  { %75 = vmatpush.msra.mxu0 %v54_v13  ;;  %396 = vmatpush.msrb.mxu2 %v850_v9  ;;  %v41_v13 = vld [vmem:[%s975_s0 + $0x10] sm:$0xff] }
  0x17   :  { %460 = vmatpush.msrb.mxu3 %v850_v9  ;;  %521 = vmatpush.msra.mxu1 %v831_v4 }
  0x18   :  { %76 = vmatpush.msra.mxu0 %v53_v14 }
  0x19   :  { %522 = vmatpush.msra.mxu1 %v837_v5 }
  0x1a   :  { %77 = vmatpush.msra.mxu0 %v52_v15 }
  0x1b   :  { %523 = vmatpush.msra.mxu1 %v842_v7 }
  0x1c   :  { %78 = vmatpush.msra.mxu0 %v51_v16 }
  0x1d   :  { %524 = vmatpush.msra.mxu1 %v850_v9 }
  0x1e   :  { %79 = vmatpush.msra.mxu0 %v50_v17 }
  0x20   :  { %80 = vmatpush.msra.mxu0 %v49_v18 }
  0x22   :  { %81 = vmatpush.msra.mxu0 %v48_v19 }
  0x24   :  { %82 = vmatpush.msra.mxu0 %v47_v20 }
  0x25   :  { %83 = vmatmul.f32.vlgmr.msra.gmra.mxu0 %v39_v21 }
  0x2d   :  { %86 = vmatmul.f32.gmra.mxu0 %v40_v49 }
  0x35   :  { %89 = vmatmul.f32.gmra.mxu0 %v41_v13 }
  0x8b   :  { %v142_v24 = vpop.f32.mrf.mxu1 }
  0xa2   :  { %v84_v23 = vpop.f32.mrf.mxu0 }
  0xa3   :  { %v85_v25 = vadd.f32 %v882_v22, %v84_v23 }
  0xa5   :  { %v145_v26 = vadd.f32 %v142_v24, %v85_v25 }
  0xa7   :  { %694 = vtanh.f32 %v145_v26  ;;  %v670_v28 = vmul.f32 -1.442695, %v145_v26 }
  0xa9   :  { %696 = vpow2.f32 %v670_v28 }
  0xaa   :  { %v87_v51 = vpop.f32.mrf.mxu0 }
  0xab   :  { %v88_v52 = vadd.f32 %v882_v22, %v87_v51 }
  0xad   :  { %v695_v27 = vpop.eup %694 }
  0xae   :  { %168 = vrot.lane.b32.xlu0 %v695_v27, %s788_s14 }
  0xaf   :  { %v697_v29 = vpop.eup %696 }
  0xb0   :  { %v149_v30 = vadd.f32 1.0, %v697_v29 }
  0xb2   :  { %698 = vrcp.f32 %v149_v30  ;;  %v161_v36 = vand.u32 2147483648, %v149_v30  ;;  %vm155_vm1 = vweird.f32 %v149_v30  ;;  %v159_v37 = vand.u32 2147483647, %v149_v30  ;;  %v90_v15 = vpop.f32.mrf.mxu0 }
  0xb3   :  { %v91_v16 = vadd.f32 %v882_v22, %v90_v15 }
  0xb4   :  { %v162_v39 = vor.u32 1.1754944e-38, %v161_v36  ;;  %vm160_vm3 = vcmp.eq.f32.partialorder %v159_v37, 8.507059e+37 }
  0xb8   :  { %v699_v31 = vpop.eup %698 }
  0xb9   :  { %v151_v32 = vmul.f32 %v699_v31, %v149_v30  ;;  %vm156_vm0 = vweird.f32 %v699_v31 }
  0xba   :  { %vm157_vm2 = vmor %vm155_vm1, %vm156_vm0 }
  0xbb   :  { %v152_v33 = vsub.f32 1.0, %v151_v32 }
  0xbd   :  { %v153_v34 = vmul.f32 %v699_v31, %v152_v33 }
  0xbf   :  { %v154_v35 = vadd.f32 %v699_v31, %v153_v34 }
  0xc1   :  { %v158_v38 = vsel %vm157_vm2, %v699_v31, %v154_v35 }
  0xc2   :  { %v163_v41 = vsel %vm160_vm3, %v162_v39, %v158_v38 }
  0xc3   :  { %v166_v43 = vmul.f32 0.0, %v163_v41 }
 0x120   :  { %v169_v40 = vpop.permute.xlu0 %168 }
 0x121   :  { %v171_v42 = vmul.f32 %v169_v40, %v163_v41  ;;  %v42_v40 = vld [vmem:[%s975_s0 + $0x18] sm:$0xff] }
 0x122   :  { %92 = vmatmul.f32.gmra.mxu0 %v42_v40 }
 0x123   :  { %173 = vrot.lane.b32.xlu0 %v171_v42, %s789_s3 }
 0x195   :  { %v174_v44 = vpop.permute.xlu0 %173 }
 0x196   :  { %v176_v45 = vadd.f32 %v174_v44, %v166_v43 }
 0x198   :  { %700 = vtanh.f32 %v176_v45 }
 0x19e   :  { %v701_v46 = vpop.eup %700 }
 0x19f   :  { %179 = vrot.lane.b32.xlu1 %v701_v46, %s788_s14  ;;  %v93_v44 = vpop.f32.mrf.mxu0 }
 0x211   :  { %v180_v47 = vpop.permute.xlu1 %179 }
 0x212   :  { %v182_v48 = vmul.f32 %v180_v47, %v163_v41 }
 0x214   :  { %185 = vrot.lane.b32.xlu1 %v182_v48, %s789_s3 }
 0x286   :  { %v186_v50 = vpop.permute.xlu1 %185 }
 0x287   :  { %671 = vmatmul.msk.f32.vlgmr.msra.gmra.mxu2 %vm121_vm4, %v186_v50 }
 0x288   :  { %585 = vmatpush.msra.mxu2 %v831_v4 }
 0x28a   :  { %586 = vmatpush.msra.mxu2 %v837_v5 }
 0x28c   :  { %587 = vmatpush.msra.mxu2 %v842_v7 }
 0x28e   :  { %588 = vmatpush.msra.mxu2 %v850_v9 }
 0x30a   :  { %v206_v53 = vpop.f32.mrf.mxu2 }
 0x30b   :  { %v209_v54 = vadd.f32 %v206_v53, %v88_v52 }
 0x30d   :  { %702 = vtanh.f32 %v209_v54  ;;  %v672_v56 = vmul.f32 -1.442695, %v209_v54 }
 0x30f   :  { %704 = vpow2.f32 %v672_v56 }
 0x313   :  { %v703_v55 = vpop.eup %702 }
 0x314   :  { %232 = vrot.lane.b32.xlu2 %v703_v55, %s788_s14 }
 0x315   :  { %v705_v57 = vpop.eup %704 }
 0x316   :  { %v213_v58 = vadd.f32 1.0, %v705_v57 }
 0x318   :  { %706 = vrcp.f32 %v213_v58  ;;  %v225_v0 = vand.u32 2147483648, %v213_v58  ;;  %vm219_vm6 = vweird.f32 %v213_v58  ;;  %v223_v1 = vand.u32 2147483647, %v213_v58 }
 0x31a   :  { %v226_v3 = vor.u32 1.1754944e-38, %v225_v0  ;;  %vm224_vm8 = vcmp.eq.f32.partialorder %v223_v1, 8.507059e+37 }
 0x31e   :  { %v707_v59 = vpop.eup %706 }
 0x31f   :  { %v215_v60 = vmul.f32 %v707_v59, %v213_v58  ;;  %vm220_vm5 = vweird.f32 %v707_v59 }
 0x320   :  { %vm221_vm7 = vmor %vm219_vm6, %vm220_vm5 }
 0x321   :  { %v216_v61 = vsub.f32 1.0, %v215_v60 }
 0x323   :  { %v217_v62 = vmul.f32 %v707_v59, %v216_v61 }
 0x325   :  { %v218_v63 = vadd.f32 %v707_v59, %v217_v62 }
 0x327   :  { %v222_v2 = vsel %vm221_vm7, %v707_v59, %v218_v63 }
 0x328   :  { %v227_v5 = vsel %vm224_vm8, %v226_v3, %v222_v2 }
 0x329   :  { %v230_v7 = vmul.f32 %v227_v5, %v176_v45  ;;  %v94_v45 = vadd.f32 %v882_v22, %v93_v44 }
 0x36e   :  { %v233_v4 = vpop.permute.xlu2 %232 }
 0x36f   :  { %v235_v6 = vmul.f32 %v233_v4, %v227_v5 }
 0x371   :  { %237 = vrot.lane.b32.xlu2 %v235_v6, %s789_s3  ;;  %v43_v6 = vld [vmem:[%s975_s0 + $0x20] sm:$0xff] }
 0x372   :  { %95 = vmatmul.f32.gmra.mxu0 %v43_v6 }
 0x3cb   :  { %v238_v8 = vpop.permute.xlu2 %237 }
 0x3cc   :  { %v240_v9 = vadd.f32 %v238_v8, %v230_v7 }
 0x3ce   :  { %708 = vtanh.f32 %v240_v9 }
 0x3d4   :  { %v709_v10 = vpop.eup %708 }
 0x3d5   :  { %243 = vrot.lane.b32.xlu0 %v709_v10, %s788_s14 }
 0x3ef   :  { %v96_v8 = vpop.f32.mrf.mxu0 }
 0x447   :  { %v244_v11 = vpop.permute.xlu0 %243 }
 0x448   :  { %v246_v12 = vmul.f32 %v244_v11, %v227_v5 }
 0x44a   :  { %249 = vrot.lane.b32.xlu1 %v246_v12, %s789_s3 }
 0x4bc   :  { %v250_v14 = vpop.permute.xlu1 %249 }
 0x4bd   :  { %673 = vmatmul.msk.f32.vlgmr.msra.gmra.mxu3 %vm121_vm4, %v250_v14 }
 0x540   :  { %v270_v17 = vpop.f32.mrf.mxu3 }
 0x541   :  { %v273_v18 = vadd.f32 %v270_v17, %v91_v16 }
 0x543   :  { %710 = vtanh.f32 %v273_v18  ;;  %v674_v20 = vmul.f32 -1.442695, %v273_v18 }
 0x545   :  { %712 = vpow2.f32 %v674_v20 }
 0x549   :  { %v711_v19 = vpop.eup %710 }
 0x54a   :  { %296 = vrot.lane.b32.xlu2 %v711_v19, %s788_s14 }
 0x54b   :  { %v713_v21 = vpop.eup %712 }
 0x54c   :  { %v277_v23 = vadd.f32 1.0, %v713_v21 }
 0x54e   :  { %714 = vrcp.f32 %v277_v23  ;;  %v289_v29 = vand.u32 2147483648, %v277_v23  ;;  %vm283_vm10 = vweird.f32 %v277_v23  ;;  %v287_v30 = vand.u32 2147483647, %v277_v23 }
 0x550   :  { %v290_v32 = vor.u32 1.1754944e-38, %v289_v29  ;;  %vm288_vm12 = vcmp.eq.f32.partialorder %v287_v30, 8.507059e+37 }
 0x554   :  { %v715_v24 = vpop.eup %714 }
 0x555   :  { %v279_v25 = vmul.f32 %v715_v24, %v277_v23  ;;  %vm284_vm9 = vweird.f32 %v715_v24 }
 0x556   :  { %vm285_vm11 = vmor %vm283_vm10, %vm284_vm9 }
 0x557   :  { %v280_v26 = vsub.f32 1.0, %v279_v25 }
 0x559   :  { %v281_v27 = vmul.f32 %v715_v24, %v280_v26 }
 0x55b   :  { %v282_v28 = vadd.f32 %v715_v24, %v281_v27 }
 0x55d   :  { %v286_v31 = vsel %vm285_vm11, %v715_v24, %v282_v28 }
 0x55e   :  { %v291_v34 = vsel %vm288_vm12, %v290_v32, %v286_v31 }
 0x55f   :  { %v294_v36 = vmul.f32 %v291_v34, %v240_v9  ;;  %v97_v9 = vadd.f32 %v882_v22, %v96_v8 }
 0x5a4   :  { %v297_v33 = vpop.permute.xlu2 %296 }
 0x5a5   :  { %v299_v35 = vmul.f32 %v297_v33, %v291_v34 }
 0x5a7   :  { %301 = vrot.lane.b32.xlu0 %v299_v35, %s789_s3  ;;  %v44_v35 = vld [vmem:[%s975_s0 + $0x28] sm:$0xff] }
 0x5a8   :  { %98 = vmatmul.f32.gmra.mxu0 %v44_v35 }
 0x619   :  { %v302_v37 = vpop.permute.xlu0 %301 }
 0x61a   :  { %v304_v38 = vadd.f32 %v302_v37, %v294_v36 }
 0x61c   :  { %716 = vtanh.f32 %v304_v38 }
 0x622   :  { %v717_v39 = vpop.eup %716 }
 0x623   :  { %307 = vrot.lane.b32.xlu1 %v717_v39, %s788_s14 }
 0x625   :  { %v99_v37 = vpop.f32.mrf.mxu0 }
 0x695   :  { %v308_v41 = vpop.permute.xlu1 %307 }
 0x696   :  { %v310_v42 = vmul.f32 %v308_v41, %v291_v34 }
 0x698   :  { %313 = vrot.lane.b32.xlu2 %v310_v42, %s789_s3 }
 0x6f2   :  { %v314_v43 = vpop.permute.xlu2 %313 }
 0x6f3   :  { %675 = vmatmul.msk.f32.vlgmr.msrb.gmra.mxu1 %vm121_vm4, %v314_v43 }
 0x770   :  { %v334_v46 = vpop.f32.mrf.mxu1 }
 0x771   :  { %v337_v47 = vadd.f32 %v334_v46, %v94_v45 }
 0x773   :  { %718 = vtanh.f32 %v337_v47  ;;  %v676_v49 = vmul.f32 -1.442695, %v337_v47 }
 0x775   :  { %720 = vpow2.f32 %v676_v49 }
 0x779   :  { %v719_v48 = vpop.eup %718 }
 0x77a   :  { %360 = vrot.lane.b32.xlu0 %v719_v48, %s788_s14 }
 0x77b   :  { %v721_v50 = vpop.eup %720 }
 0x77c   :  { %v341_v51 = vadd.f32 1.0, %v721_v50 }
 0x77e   :  { %722 = vrcp.f32 %v341_v51  ;;  %v353_v57 = vand.u32 2147483648, %v341_v51  ;;  %vm347_vm14 = vweird.f32 %v341_v51  ;;  %v351_v58 = vand.u32 2147483647, %v341_v51 }
 0x780   :  { %v354_v60 = vor.u32 1.1754944e-38, %v353_v57  ;;  %vm352_vm0 = vcmp.eq.f32.partialorder %v351_v58, 8.507059e+37 }
 0x784   :  { %v723_v52 = vpop.eup %722 }
 0x785   :  { %v343_v53 = vmul.f32 %v723_v52, %v341_v51  ;;  %vm348_vm13 = vweird.f32 %v723_v52 }
 0x786   :  { %vm349_vm15 = vmor %vm347_vm14, %vm348_vm13 }
 0x787   :  { %v344_v54 = vsub.f32 1.0, %v343_v53 }
 0x789   :  { %v345_v55 = vmul.f32 %v723_v52, %v344_v54 }
 0x78b   :  { %v346_v56 = vadd.f32 %v723_v52, %v345_v55 }
 0x78d   :  { %v350_v59 = vsel %vm349_vm15, %v723_v52, %v346_v56 }
 0x78e   :  { %v355_v62 = vsel %vm352_vm0, %v354_v60, %v350_v59 }
 0x78f   :  { %v358_v0 = vmul.f32 %v355_v62, %v304_v38  ;;  %v100_v38 = vadd.f32 %v882_v22, %v99_v37 }
 0x7ec   :  { %v361_v61 = vpop.permute.xlu0 %360 }
 0x7ed   :  { %v363_v63 = vmul.f32 %v361_v61, %v355_v62  ;;  %v45_v61 = vld [vmem:[%s975_s0 + $0x30] sm:$0xff] }
 0x7ee   :  { %101 = vmatmul.f32.gmra.mxu0 %v45_v61 }
 0x7ef   :  { %365 = vrot.lane.b32.xlu1 %v363_v63, %s789_s3 }
 0x861   :  { %v366_v1 = vpop.permute.xlu1 %365 }
 0x862   :  { %v368_v2 = vadd.f32 %v366_v1, %v358_v0 }
 0x864   :  { %724 = vtanh.f32 %v368_v2 }
 0x86a   :  { %v725_v3 = vpop.eup %724 }
 0x86b   :  { %371 = vrot.lane.b32.xlu2 %v725_v3, %s788_s14  ;;  %v102_v1 = vpop.f32.mrf.mxu0 }
 0x8c5   :  { %v372_v4 = vpop.permute.xlu2 %371 }
 0x8c6   :  { %v374_v5 = vmul.f32 %v372_v4, %v355_v62 }
 0x8c8   :  { %377 = vrot.lane.b32.xlu0 %v374_v5, %s789_s3 }
 0x93a   :  { %v378_v7 = vpop.permute.xlu0 %377 }
 0x93b   :  { %677 = vmatmul.msk.f32.vlgmr.msrb.gmra.mxu2 %vm121_vm4, %v378_v7 }
 0x9be   :  { %v398_v10 = vpop.f32.mrf.mxu2 }
 0x9bf   :  { %v401_v11 = vadd.f32 %v398_v10, %v97_v9 }
 0x9c1   :  { %726 = vtanh.f32 %v401_v11  ;;  %v678_v13 = vmul.f32 -1.442695, %v401_v11 }
 0x9c3   :  { %728 = vpow2.f32 %v678_v13 }
 0x9c7   :  { %v727_v12 = vpop.eup %726 }
 0x9c8   :  { %424 = vrot.lane.b32.xlu1 %v727_v12, %s788_s14 }
 0x9c9   :  { %v729_v14 = vpop.eup %728 }
 0x9ca   :  { %v405_v15 = vadd.f32 1.0, %v729_v14 }
 0x9cc   :  { %730 = vrcp.f32 %v405_v15  ;;  %v417_v21 = vand.u32 2147483648, %v405_v15  ;;  %vm411_vm2 = vweird.f32 %v405_v15  ;;  %v415_v23 = vand.u32 2147483647, %v405_v15 }
 0x9ce   :  { %v418_v25 = vor.u32 1.1754944e-38, %v417_v21  ;;  %vm416_vm5 = vcmp.eq.f32.partialorder %v415_v23, 8.507059e+37 }
 0x9d2   :  { %v731_v16 = vpop.eup %730 }
 0x9d3   :  { %v407_v17 = vmul.f32 %v731_v16, %v405_v15  ;;  %vm412_vm1 = vweird.f32 %v731_v16 }
 0x9d4   :  { %vm413_vm3 = vmor %vm411_vm2, %vm412_vm1 }
 0x9d5   :  { %v408_v18 = vsub.f32 1.0, %v407_v17 }
 0x9d7   :  { %v409_v19 = vmul.f32 %v731_v16, %v408_v18 }
 0x9d9   :  { %v410_v20 = vadd.f32 %v731_v16, %v409_v19 }
 0x9db   :  { %v414_v24 = vsel %vm413_vm3, %v731_v16, %v410_v20 }
 0x9dc   :  { %v419_v27 = vsel %vm416_vm5, %v418_v25, %v414_v24 }
 0x9dd   :  { %v422_v29 = vmul.f32 %v419_v27, %v368_v2  ;;  %v103_v2 = vadd.f32 %v882_v22, %v102_v1 }
 0xa3a   :  { %v425_v26 = vpop.permute.xlu1 %424 }
 0xa3b   :  { %v427_v28 = vmul.f32 %v425_v26, %v419_v27 }
 0xa3d   :  { %429 = vrot.lane.b32.xlu2 %v427_v28, %s789_s3  ;;  %v46_v28 = vld [vmem:[%s975_s0 + $0x38] sm:$0xff] }
 0xa3e   :  { %104 = vmatmul.f32.gmra.mxu0 %v46_v28 }
 0xa97   :  { %v430_v30 = vpop.permute.xlu2 %429 }
 0xa98   :  { %v432_v31 = vadd.f32 %v430_v30, %v422_v29 }
 0xa9a   :  { %732 = vtanh.f32 %v432_v31 }
 0xaa0   :  { %v733_v32 = vpop.eup %732 }
 0xaa1   :  { %435 = vrot.lane.b32.xlu0 %v733_v32, %s788_s14 }
 0xabb   :  { %v105_v30 = vpop.f32.mrf.mxu0 }
 0xb13   :  { %v436_v33 = vpop.permute.xlu0 %435 }
 0xb14   :  { %v438_v34 = vmul.f32 %v436_v33, %v419_v27 }
 0xb16   :  { %441 = vrot.lane.b32.xlu1 %v438_v34, %s789_s3 }
 0xb88   :  { %v442_v36 = vpop.permute.xlu1 %441 }
 0xb89   :  { %679 = vmatmul.msk.f32.vlgmr.msrb.gmra.mxu3 %vm121_vm4, %v442_v36 }
 0xc0c   :  { %v462_v39 = vpop.f32.mrf.mxu3 }
 0xc0d   :  { %v465_v40 = vadd.f32 %v462_v39, %v100_v38 }
 0xc0f   :  { %734 = vtanh.f32 %v465_v40  ;;  %v680_v42 = vmul.f32 -1.442695, %v465_v40 }
 0xc11   :  { %736 = vpow2.f32 %v680_v42 }
 0xc15   :  { %v735_v41 = vpop.eup %734 }
 0xc16   :  { %488 = vrot.lane.b32.xlu2 %v735_v41, %s788_s14 }
 0xc17   :  { %v737_v43 = vpop.eup %736 }
 0xc18   :  { %v469_v44 = vadd.f32 1.0, %v737_v43 }
 0xc1a   :  { %738 = vrcp.f32 %v469_v44  ;;  %v481_v50 = vand.u32 2147483648, %v469_v44  ;;  %vm475_vm7 = vweird.f32 %v469_v44  ;;  %v479_v51 = vand.u32 2147483647, %v469_v44 }
 0xc1c   :  { %v482_v53 = vor.u32 1.1754944e-38, %v481_v50  ;;  %vm480_vm9 = vcmp.eq.f32.partialorder %v479_v51, 8.507059e+37 }
 0xc20   :  { %v739_v45 = vpop.eup %738 }
 0xc21   :  { %v471_v46 = vmul.f32 %v739_v45, %v469_v44  ;;  %vm476_vm6 = vweird.f32 %v739_v45 }
 0xc22   :  { %vm477_vm8 = vmor %vm475_vm7, %vm476_vm6 }
 0xc23   :  { %v472_v47 = vsub.f32 1.0, %v471_v46 }
 0xc25   :  { %v473_v48 = vmul.f32 %v739_v45, %v472_v47 }
 0xc27   :  { %v474_v49 = vadd.f32 %v739_v45, %v473_v48 }
 0xc29   :  { %v478_v52 = vsel %vm477_vm8, %v739_v45, %v474_v49 }
 0xc2a   :  { %v483_v55 = vsel %vm480_vm9, %v482_v53, %v478_v52  ;;  %v634_v53 = vld [vmem:[%s979_s4 + $0x18] sm:$0xff] }
 0xc2b   :  { %v486_v57 = vmul.f32 %v483_v55, %v432_v31  ;;  %v106_v31 = vadd.f32 %v882_v22, %v105_v30  ;;  %656 = vmatpush.msra.mxu3 %v634_v53 }
 0xc70   :  { %v489_v54 = vpop.permute.xlu2 %488 }
 0xc71   :  { %v491_v56 = vmul.f32 %v489_v54, %v483_v55  ;;  %v633_v54 = vld [vmem:[%s979_s4 + $0x10] sm:$0xff] }
 0xc72   :  { %657 = vmatpush.msra.mxu3 %v633_v54 }
 0xc73   :  { %493 = vrot.lane.b32.xlu0 %v491_v56, %s789_s3  ;;  %v631_v56 = vld [vmem:[%s979_s4] sm:$0xff] }
 0xce5   :  { %v494_v58 = vpop.permute.xlu0 %493 }
 0xce6   :  { %v496_v59 = vadd.f32 %v494_v58, %v486_v57 }
 0xce8   :  { %740 = vtanh.f32 %v496_v59 }
 0xcee   :  { %v741_v60 = vpop.eup %740 }
 0xcef   :  { %499 = vrot.lane.b32.xlu1 %v741_v60, %s788_s14  ;;  %v693_v60 = vld [vmem:[%s980_s5] ss:$0 sm:$0xff] }
 0xd61   :  { %v500_v62 = vpop.permute.xlu1 %499 }
 0xd62   :  { %v502_v63 = vmul.f32 %v500_v62, %v483_v55  ;;  %v632_v55 = vld [vmem:[%s979_s4 + $0x8] sm:$0xff] }
 0xd63   :  { %658 = vmatpush.msra.mxu3 %v632_v55 }
 0xd64   :  { %505 = vrot.lane.b32.xlu2 %v502_v63, %s789_s3 }
 0xd65   :  { %659 = vmatpush.msra.mxu3 %v631_v56 }
 0xdbe   :  { %v506_v0 = vpop.permute.xlu2 %505 }
 0xdbf   :  { %681 = vmatmul.msk.f32.vlgmr.msra.gmra.mxu1 %vm121_vm4, %v506_v0 }
 0xe3c   :  { %v526_v3 = vpop.f32.mrf.mxu1 }
 0xe3d   :  { %v529_v4 = vadd.f32 %v526_v3, %v103_v2 }
 0xe3f   :  { %742 = vtanh.f32 %v529_v4  ;;  %v682_v6 = vmul.f32 -1.442695, %v529_v4 }
 0xe41   :  { %744 = vpow2.f32 %v682_v6 }
 0xe45   :  { %v743_v5 = vpop.eup %742 }
 0xe46   :  { %552 = vrot.lane.b32.xlu0 %v743_v5, %s788_s14 }
 0xe47   :  { %v745_v7 = vpop.eup %744 }
 0xe48   :  { %v533_v8 = vadd.f32 1.0, %v745_v7 }
 0xe4a   :  { %746 = vrcp.f32 %v533_v8  ;;  %v545_v14 = vand.u32 2147483648, %v533_v8  ;;  %vm539_vm11 = vweird.f32 %v533_v8  ;;  %v543_v15 = vand.u32 2147483647, %v533_v8 }
 0xe4c   :  { %v546_v17 = vor.u32 1.1754944e-38, %v545_v14  ;;  %vm544_vm13 = vcmp.eq.f32.partialorder %v543_v15, 8.507059e+37 }
 0xe50   :  { %v747_v9 = vpop.eup %746 }
 0xe51   :  { %v535_v10 = vmul.f32 %v747_v9, %v533_v8  ;;  %vm540_vm10 = vweird.f32 %v747_v9 }
 0xe52   :  { %vm541_vm12 = vmor %vm539_vm11, %vm540_vm10 }
 0xe53   :  { %v536_v11 = vsub.f32 1.0, %v535_v10 }
 0xe55   :  { %v537_v12 = vmul.f32 %v747_v9, %v536_v11 }
 0xe57   :  { %v538_v13 = vadd.f32 %v747_v9, %v537_v12 }
 0xe59   :  { %v542_v16 = vsel %vm541_vm12, %v747_v9, %v538_v13 }
 0xe5a   :  { %v547_v19 = vsel %vm544_vm13, %v546_v17, %v542_v16 }
 0xe5b   :  { %v550_v21 = vmul.f32 %v547_v19, %v496_v59 }
 0xeb8   :  { %v553_v18 = vpop.permute.xlu0 %552 }
 0xeb9   :  { %v555_v20 = vmul.f32 %v553_v18, %v547_v19 }
 0xebb   :  { %557 = vrot.lane.b32.xlu1 %v555_v20, %s789_s3 }
 0xf2d   :  { %v558_v23 = vpop.permute.xlu1 %557 }
 0xf2e   :  { %v560_v24 = vadd.f32 %v558_v23, %v550_v21 }
 0xf30   :  { %748 = vtanh.f32 %v560_v24 }
 0xf36   :  { %v749_v25 = vpop.eup %748 }
 0xf37   :  { %563 = vrot.lane.b32.xlu2 %v749_v25, %s788_s14 }
 0xf91   :  { %v564_v26 = vpop.permute.xlu2 %563 }
 0xf92   :  { %v566_v27 = vmul.f32 %v564_v26, %v547_v19 }
 0xf94   :  { %569 = vrot.lane.b32.xlu0 %v566_v27, %s789_s3 }
0x1006   :  { %v570_v29 = vpop.permute.xlu0 %569 }
0x1007   :  { %683 = vmatmul.msk.f32.vlgmr.msra.gmra.mxu2 %vm121_vm4, %v570_v29 }
0x108a   :  { %v590_v32 = vpop.f32.mrf.mxu2 }
0x108b   :  { %v593_v33 = vadd.f32 %v590_v32, %v106_v31 }
0x108d   :  { %750 = vtanh.f32 %v593_v33  ;;  %v684_v35 = vmul.f32 -1.442695, %v593_v33 }
0x108f   :  { %752 = vpow2.f32 %v684_v35 }
0x1093   :  { %v751_v34 = vpop.eup %750 }
0x1094   :  { %616 = vrot.lane.b32.xlu1 %v751_v34, %s788_s14 }
0x1095   :  { %v753_v36 = vpop.eup %752 }
0x1096   :  { %v597_v37 = vadd.f32 1.0, %v753_v36 }
0x1098   :  { %754 = vrcp.f32 %v597_v37  ;;  %v609_v43 = vand.u32 2147483648, %v597_v37  ;;  %vm603_vm15 = vweird.f32 %v597_v37  ;;  %v607_v22 = vand.u32 2147483647, %v597_v37 }
0x109a   :  { %v610_v45 = vor.u32 1.1754944e-38, %v609_v43  ;;  %vm608_vm1 = vcmp.eq.f32.partialorder %v607_v22, 8.507059e+37 }
0x109e   :  { %v755_v38 = vpop.eup %754 }
0x109f   :  { %v599_v39 = vmul.f32 %v755_v38, %v597_v37  ;;  %vm604_vm14 = vweird.f32 %v755_v38 }
0x10a0   :  { %vm605_vm0 = vmor %vm603_vm15, %vm604_vm14 }
0x10a1   :  { %v600_v40 = vsub.f32 1.0, %v599_v39 }
0x10a3   :  { %v601_v41 = vmul.f32 %v755_v38, %v600_v40 }
0x10a5   :  { %v602_v42 = vadd.f32 %v755_v38, %v601_v41 }
0x10a7   :  { %v606_v44 = vsel %vm605_vm0, %v755_v38, %v602_v42 }
0x10a8   :  { %v611_v47 = vsel %vm608_vm1, %v610_v45, %v606_v44 }
0x10a9   :  { %v614_v49 = vmul.f32 %v611_v47, %v560_v24 }
0x1106   :  { %v617_v46 = vpop.permute.xlu1 %616 }
0x1107   :  { %v619_v48 = vmul.f32 %v617_v46, %v611_v47 }
0x1109   :  { %621 = vrot.lane.b32.xlu2 %v619_v48, %s789_s3 }
0x1163   :  { %v622_v50 = vpop.permute.xlu2 %621 }
0x1164   :  { %v624_v51 = vadd.f32 %v622_v50, %v614_v49 }
0x1166   :  { %756 = vtanh.f32 %v624_v51 }
0x116c   :  { %v757_v52 = vpop.eup %756 }
0x116d   :  { %627 = vrot.lane.b32.xlu0 %v757_v52, %s788_s14 }
0x11df   :  { %v628_v57 = vpop.permute.xlu0 %627 }
0x11e0   :  { %v630_v58 = vmul.f32 %v628_v57, %v611_v47 }
0x11e2   :  { %640 = vrot.lane.b32.xlu1 %v630_v58, %s789_s3 }
0x1254   :  { %v641_v59 = vpop.permute.xlu1 %640 }
0x1255   :  { %685 = vmatmul.msk.f32.vlgmr.msra.gmra.mxu3 %vm121_vm4, %v641_v59 }
0x12d8   :  { %v661_v61 = vpop.f32.mrf.mxu3 }
0x12d9   :  { %v662_v62 = vadd.f32 %v693_v60, %v661_v61 }
0x12db   :  { %664 = vst [vmem:[%s981_s6] sm:$0xff] %v662_v62 }
0x12dc   :  { %669 = vsyncpa [#allocation4], 1 }

</bundles_post_ra>
